<compile_context>
chip_gen: v5e
topology: v5e:2x2
jax: 0.10.0
libtpu: 0.0.40
codegen_flags: <defaults>
</compile_context>

<pallas_src>
import math
import functools

import numpy as np
import jax
import jax.numpy as jnp
from jax.experimental import pallas as pl
from jax.experimental.pallas import tpu as pltpu


_VMEM_LIMIT = 32 * 1024 * 1024  # explicit scoped-VMEM budget (safe on v5e/v6e/v7x)


# --------------------------------------------------------------------------------------
# Pallas kernels
# --------------------------------------------------------------------------------------

def _mm_bn_act_kernel(x_ref, w_ref, s_ref, b_ref, o_ref, *, relu6):
    """y = act((x @ w) * scale + bias)   (1x1 conv + BN fused as a bf16 MXU matmul)."""
    y = jnp.dot(x_ref[...], w_ref[...], preferred_element_type=jnp.float32)
    y = y * s_ref[...] + b_ref[...]
    if relu6:
        y = jnp.clip(y, 0.0, 6.0)
    o_ref[...] = y.astype(o_ref.dtype)


def _mm_bn_res_kernel(x_ref, w_ref, s_ref, b_ref, r_ref, o_ref):
    """y = (x @ w) * scale + bias + residual   (linear bottleneck projection + skip)."""
    y = jnp.dot(x_ref[...], w_ref[...], preferred_element_type=jnp.float32)
    y = y * s_ref[...] + b_ref[...]
    o_ref[...] = (y + r_ref[...].astype(jnp.float32)).astype(o_ref.dtype)


def _dw_bn_relu6_kernel(x_ref, w_ref, s_ref, b_ref, o_ref, *, stride, th, wo):
    """Depthwise 3x3 conv + BN + ReLU6 for one (batch, row-tile) block.

    x_ref block: (1, P, th + halo, wb, C) where
      stride == 1: P = 1, base = padded input rows, halo = 2
      stride == 2: P = 4, base = even/odd row/col parity planes,  halo = 1
    All 9 taps are unit-stride static slices of the loaded block.
    """
    c = o_ref.shape[-1]
    v = x_ref[0].astype(jnp.float32)          # (P, th+halo, wb, C)
    acc = jnp.zeros((th, wo, c), jnp.float32)
    for dh in range(3):
        for dw in range(3):
            p = (dh % stride) * stride + (dw % stride)
            r0 = dh // stride
            c0 = dw // stride
            tap = v[p, r0:r0 + th, c0:c0 + wo, :]
            acc = acc + tap * w_ref[3 * dh + dw]
    y = acc * s_ref[0] + b_ref[0]
    o_ref[0] = jnp.clip(y, 0.0, 6.0).astype(o_ref.dtype)


# --------------------------------------------------------------------------------------
# Pallas wrappers
# --------------------------------------------------------------------------------------

def _largest_divisor(n, cap):
    for d in range(min(n, cap), 0, -1):
        if n % d == 0:
            return d
    return 1


def matmul_bn(x, w, scale, bias, *, relu6, residual=None, bm_cap=512):
    """x: (M, K), w: (K, C) -> (M, C) bf16, with fused BN (+ ReLU6 / residual).

    Inputs are cast to bf16 (MXU rate, half the HBM traffic); accumulation and BN
    are f32.  Rows are tiled with a bounded tile (padded when M isn't divisible).
    """
    m, k = x.shape
    c = w.shape[1]
    x = x.astype(jnp.bfloat16)
    w = w.astype(jnp.bfloat16)
    scale2 = scale.reshape(1, c).astype(jnp.float32)
    bias2 = bias.reshape(1, c).astype(jnp.float32)
    if residual is not None:
        residual = residual.astype(jnp.bfloat16)

    # Pad K to a multiple of 8 (e.g. stem im2col 27 -> 32).
    if k % 8 != 0:
        kp = (k + 7) // 8 * 8
        x = jnp.pad(x, ((0, 0), (0, kp - k)))
        w = jnp.pad(w, ((0, kp - k), (0, 0)))
        k = kp

    # Bounded row tile; pad M instead of falling back to a single giant block.
    bm = m if m <= bm_cap else bm_cap
    m_pad = pl.cdiv(m, bm) * bm
    if m_pad != m:
        x = jnp.pad(x, ((0, m_pad - m), (0, 0)))
        if residual is not None:
            residual = jnp.pad(residual, ((0, m_pad - m), (0, 0)))

    grid = (m_pad // bm,)
    in_specs = [
        pl.BlockSpec((bm, k), lambda i: (i, 0)),
        pl.BlockSpec((k, c), lambda i: (0, 0)),
        pl.BlockSpec((1, c), lambda i: (0, 0)),
        pl.BlockSpec((1, c), lambda i: (0, 0)),
    ]
    args = [x, w, scale2, bias2]
    if residual is not None:
        kernel = _mm_bn_res_kernel
        in_specs.append(pl.BlockSpec((bm, c), lambda i: (i, 0)))
        args.append(residual)
    else:
        kernel = functools.partial(_mm_bn_act_kernel, relu6=relu6)

    out = pl.pallas_call(
        kernel,
        out_shape=jax.ShapeDtypeStruct((m_pad, c), jnp.bfloat16),
        grid=grid,
        in_specs=in_specs,
        out_specs=pl.BlockSpec((bm, c), lambda i: (i, 0)),
        compiler_params=pltpu.CompilerParams(
            dimension_semantics=("parallel",),
            vmem_limit_bytes=_VMEM_LIMIT,
        ),
    )(*args)
    return out[:m] if m_pad != m else out


def conv1x1_bn(x, w, scale, bias, *, relu6, residual=None):
    """x: (N, H, W, Cin) bf16, w: (Cin, Cout)."""
    n, h, wd, cin = x.shape
    cout = w.shape[1]
    x2 = x.reshape(n * h * wd, cin)
    r2 = residual.reshape(n * h * wd, cout) if residual is not None else None
    y = matmul_bn(x2, w, scale, bias, relu6=relu6, residual=r2)
    return y.reshape(n, h, wd, cout)


def depthwise_bn_relu6(x, w, scale, bias, *, stride, row_tile_cap=32):
    """x: (N, H, W, C), w: (3, 3, C) depthwise weights, pad=1.

    Glue builds a row-windowed copy of the (parity-split, for stride 2) padded input
    so the kernel reads ~1x the input (only per-tile halo rows are duplicated) and
    extracts the 9 taps in-kernel -- no HBM tap materialization.
    """
    n, h, wd, c = x.shape
    x = x.astype(jnp.bfloat16)
    ho = (h + 2 - 3) // stride + 1
    wo = (wd + 2 - 3) // stride + 1
    xp = jnp.pad(x, ((0, 0), (1, 1), (1, 1), (0, 0)))

    if stride == 1:
        base = xp[:, None]                       # (N, 1, ho+2, wo+2, C)
        halo = 2
    else:
        # Even/odd parity split: tap (dh, dw) becomes a unit-stride slice of plane
        # P[dh%2, dw%2] at offset (dh//2, dw//2).
        parts = []
        for ph in range(2):
            for pw in range(2):
                t = xp[:, ph::2, pw::2, :]
                t = jnp.pad(t, ((0, 0),
                                (0, ho + 1 - t.shape[1]),
                                (0, wo + 1 - t.shape[2]),
                                (0, 0)))
                parts.append(t)
        base = jnp.stack(parts, axis=1)          # (N, 4, ho+1, wo+1, C)
        halo = 1

    p_count = base.shape[1]
    wb = base.shape[3]
    th = _largest_divisor(ho, row_tile_cap)      # output rows per tile
    rt = ho // th

    if rt == 1:
        wins = base                              # (N, P, ho+halo, wb, C)
    else:
        wins = jnp.stack([base[:, :, r * th:r * th + th + halo] for r in range(rt)],
                         axis=1)                 # (N, rt, P, th+halo, wb, C)
    wins = wins.reshape(n * rt, p_count, th + halo, wb, c)

    kernel = functools.partial(_dw_bn_relu6_kernel, stride=stride, th=th, wo=wo)
    out = pl.pallas_call(
        kernel,
        out_shape=jax.ShapeDtypeStruct((n * rt, th, wo, c), jnp.bfloat16),
        grid=(n * rt,),
        in_specs=[
            pl.BlockSpec((1, p_count, th + halo, wb, c), lambda g: (g, 0, 0, 0, 0)),
            pl.BlockSpec((9, c), lambda g: (0, 0)),
            pl.BlockSpec((1, c), lambda g: (0, 0)),
            pl.BlockSpec((1, c), lambda g: (0, 0)),
        ],
        out_specs=pl.BlockSpec((1, th, wo, c), lambda g: (g, 0, 0, 0)),
        compiler_params=pltpu.CompilerParams(
            dimension_semantics=("parallel",),
            vmem_limit_bytes=_VMEM_LIMIT,
        ),
    )(wins,
      w.reshape(9, c).astype(jnp.float32),
      scale.reshape(1, c).astype(jnp.float32),
      bias.reshape(1, c).astype(jnp.float32))
    return out.reshape(n, ho, wo, c)


def _shifted_taps(xp, stride, ho, wo):
    """Extract the 9 shifted/strided 3x3 taps from a padded NHWC tensor (stem glue only)."""
    n, _, _, c = xp.shape
    taps = []
    for dh in range(3):
        for dw in range(3):
            taps.append(
                jax.lax.slice(
                    xp,
                    (0, dh, dw, 0),
                    (n, dh + stride * (ho - 1) + 1, dw + stride * (wo - 1) + 1, c),
                    (1, stride, stride, 1),
                )
            )
    return taps


def conv3x3_bn_relu6(x, w, scale, bias, *, stride):
    """Standard 3x3 conv (pad=1) + BN + ReLU6 via im2col (glue) + fused matmul kernel.

    Only used for the 3-channel stem, so the im2col patch tensor is small.
    x: (N, H, W, Cin), w: (3, 3, Cin, Cout).
    """
    n, h, wd, cin = x.shape
    cout = w.shape[-1]
    x = x.astype(jnp.bfloat16)
    ho = (h + 2 - 3) // stride + 1
    wo = (wd + 2 - 3) // stride + 1
    xp = jnp.pad(x, ((0, 0), (1, 1), (1, 1), (0, 0)))
    patches = jnp.concatenate(_shifted_taps(xp, stride, ho, wo), axis=-1)  # (N,Ho,Wo,9*Cin)
    x2 = patches.reshape(n * ho * wo, 9 * cin)
    w2 = w.reshape(9 * cin, cout)
    y = matmul_bn(x2, w2, scale, bias, relu6=True)   # K padded 27 -> 32 inside
    return y.reshape(n, ho, wo, cout)


# --------------------------------------------------------------------------------------
# Parameter construction (deterministic, mirrors MobileNetV2Backbone.__init__)
# --------------------------------------------------------------------------------------

def make_divisible(value, divisor=8, min_value=None):
    if min_value is None:
        min_value = divisor
    new_value = max(min_value, int(value + divisor / 2) // divisor * divisor)
    if new_value < 0.9 * value:
        new_value += divisor
    return new_value


def _init_bn(key, c):
    k1, k2, k3, k4 = jax.random.split(key, 4)
    gamma = 1.0 + 0.1 * jax.random.normal(k1, (c,), jnp.float32)
    beta = 0.05 * jax.random.normal(k2, (c,), jnp.float32)
    mean = 0.05 * jax.random.normal(k3, (c,), jnp.float32)
    var = jax.random.uniform(k4, (c,), jnp.float32, 0.5, 1.5)
    scale = gamma * jax.lax.rsqrt(var + 1e-5)
    bias = beta - mean * scale
    return scale, bias


def _init_inverted_residual(key, inp, oup, stride, expand_ratio):
    hidden = int(inp * expand_ratio)
    keys = jax.random.split(key, 6)
    p = {
        "stride": stride,
        "use_res": stride == 1 and inp == oup,
        "expand": expand_ratio != 1,
    }
    if p["expand"]:
        p["exp_w"] = jax.random.normal(keys[0], (inp, hidden), jnp.float32) / math.sqrt(inp)
        p["exp_scale"], p["exp_bias"] = _init_bn(keys[1], hidden)
    p["dw_w"] = jax.random.normal(keys[2], (3, 3, hidden), jnp.float32) / 3.0
    p["dw_scale"], p["dw_bias"] = _init_bn(keys[3], hidden)
    p["proj_w"] = jax.random.normal(keys[4], (hidden, oup), jnp.float32) / math.sqrt(hidden)
    p["proj_scale"], p["proj_bias"] = _init_bn(keys[5], oup)
    return p


def build_params(key, inverted_residual_setting, width_mult=1.0, round_nearest=8):
    input_channel = make_divisible(32 * width_mult, round_nearest)
    last_channel = make_divisible(1280 * max(1.0, width_mult), round_nearest)
    layers = []

    key, k1, k2 = jax.random.split(key, 3)
    w = jax.random.normal(k1, (3, 3, 3, input_channel), jnp.float32) / math.sqrt(27.0)
    scale, bias = _init_bn(k2, input_channel)
    layers.append({"type": "conv3x3", "stride": 2, "w": w, "scale": scale, "bias": bias})

    for t_val, c_val, n_val, s_val in inverted_residual_setting:
        output_channel = make_divisible(c_val * width_mult, round_nearest)
        blocks = []
        for i in range(n_val):
            stride = s_val if i == 0 else 1
            key, kb = jax.random.split(key)
            blocks.append(_init_inverted_residual(kb, input_channel, output_channel, stride, t_val))
            input_channel = output_channel
        layers.append({"type": "stage", "blocks": blocks})

    key, k1, k2 = jax.random.split(key, 3)
    w = jax.random.normal(k1, (input_channel, last_channel), jnp.float32) / math.sqrt(input_channel)
    scale, bias = _init_bn(k2, last_channel)
    layers.append({"type": "conv1x1", "w": w, "scale": scale, "bias": bias})
    return layers


# --------------------------------------------------------------------------------------
# Forward pass (Pallas) and pure-XLA reference (same bf16/f32 dtype strategy)
# --------------------------------------------------------------------------------------

def _ir_forward(p, x):
    identity = x
    h = x
    if p["expand"]:
        h = conv1x1_bn(h, p["exp_w"], p["exp_scale"], p["exp_bias"], relu6=True)
    h = depthwise_bn_relu6(h, p["dw_w"], p["dw_scale"], p["dw_bias"], stride=p["stride"])
    if p["use_res"]:
        return conv1x1_bn(h, p["proj_w"], p["proj_scale"], p["proj_bias"],
                          relu6=False, residual=identity)
    return conv1x1_bn(h, p["proj_w"], p["proj_scale"], p["proj_bias"], relu6=False)


def forward(params, x_nchw):
    """Returns a tuple of convouts (one per layer), NCHW f32, like the PyTorch module."""
    x = jnp.transpose(x_nchw, (0, 2, 3, 1)).astype(jnp.bfloat16)  # NCHW -> NHWC, bf16
    outs = []
    for layer in params:
        if layer["type"] == "conv3x3":
            x = conv3x3_bn_relu6(x, layer["w"], layer["scale"], layer["bias"],
                                 stride=layer["stride"])
        elif layer["type"] == "conv1x1":
            x = conv1x1_bn(x, layer["w"], layer["scale"], layer["bias"], relu6=True)
        else:  # stage of InvertedResidual blocks
            for blk in layer["blocks"]:
                x = _ir_forward(blk, x)
        # Only the returned stage outputs get transposed/cast; internal flow stays NHWC bf16.
        outs.append(jnp.transpose(x, (0, 3, 1, 2)).astype(jnp.float32))
    return tuple(outs)


# ---- pure-XLA reference (numerical validation; mirrors the kernel's bf16 strategy) ----

_DN = ("NHWC", "HWIO", "NHWC")
_HI = jax.lax.Precision.HIGHEST


def _ref_conv3x3(x, w, scale, bias, stride):
    y = jax.lax.conv_general_dilated(x, w.astype(jnp.bfloat16), (stride, stride),
                                     ((1, 1), (1, 1)), dimension_numbers=_DN,
                                     preferred_element_type=jnp.float32)
    return jnp.clip(y * scale + bias, 0.0, 6.0).astype(jnp.bfloat16)


def _ref_dw(x, w, scale, bias, stride):
    c = x.shape[-1]
    y = jax.lax.conv_general_dilated(x.astype(jnp.float32), w.reshape(3, 3, 1, c),
                                     (stride, stride), ((1, 1), (1, 1)),
                                     dimension_numbers=_DN, feature_group_count=c,
                                     precision=_HI)
    return jnp.clip(y * scale + bias, 0.0, 6.0).astype(jnp.bfloat16)


def _ref_1x1(x, w, scale, bias, relu6, residual=None):
    y = jnp.einsum("nhwc,cd->nhwd", x, w.astype(jnp.bfloat16),
                   preferred_element_type=jnp.float32)
    y = y * scale + bias
    if relu6:
        y = jnp.clip(y, 0.0, 6.0)
    if residual is not None:
        y = y + residual.astype(jnp.float32)
    return y.astype(jnp.bfloat16)


def ref_forward(params, x_nchw):
    x = jnp.transpose(x_nchw, (0, 2, 3, 1)).astype(jnp.bfloat16)
    outs = []
    for layer in params:
        if layer["type"] == "conv3x3":
            x = _ref_conv3x3(x, layer["w"], layer["scale"], layer["bias"], layer["stride"])
        elif layer["type"] == "conv1x1":
            x = _ref_1x1(x, layer["w"], layer["scale"], layer["bias"], relu6=True)
        else:
            for p in layer["blocks"]:
                identity = x
                h = x
                if p["expand"]:
                    h = _ref_1x1(h, p["exp_w"], p["exp_scale"], p["exp_bias"], relu6=True)
                h = _ref_dw(h, p["dw_w"], p["dw_scale"], p["dw_bias"], p["stride"])
                h = _ref_1x1(h, p["proj_w"], p["proj_scale"], p["proj_bias"], relu6=False,
                             residual=identity if p["use_res"] else None)
                x = h
        outs.append(jnp.transpose(x, (0, 3, 1, 2)).astype(jnp.float32))
    return tuple(outs)


# --------------------------------------------------------------------------------------

if __name__ == "__main__":
    key = jax.random.PRNGKey(0)
    kp, kx, kt = jax.random.split(key, 3)

    # Small MobileNetV2 inverted-residual setting (t, c, n, s) — same structure, fewer stages.
    inverted_residual_setting = [
        [1, 16, 1, 1],
        [6, 24, 2, 2],
    ]
    params = build_params(kp, inverted_residual_setting, width_mult=1.0, round_nearest=8)

    x = jax.random.normal(kx, (2, 3, 32, 32), jnp.float32)  # NCHW, like the PyTorch module

    outs = jax.block_until_ready(forward(params, x))
    refs = jax.block_until_ready(ref_forward(params, x))
    assert len(outs) == len(refs) == len(inverted_residual_setting) + 2
    for o, r in zip(outs, refs):
        assert o.shape == r.shape and o.dtype == r.dtype
        np.testing.assert_allclose(np.asarray(o), np.asarray(r), rtol=5e-2, atol=5e-2)

    # Extra coverage: spatially tiled depthwise path (multiple row tiles, both strides).
    k1, k2, k3, k4, k5, k6 = jax.random.split(kt, 6)
    xdw = jax.random.normal(k1, (1, 80, 24, 32), jnp.float32)
    wdw = jax.random.normal(k2, (3, 3, 32), jnp.float32) / 3.0
    sdw, bdw = _init_bn(k3, 32)
    for s in (1, 2):
        got = depthwise_bn_relu6(xdw.astype(jnp.bfloat16), wdw, sdw, bdw, stride=s)
        want = _ref_dw(xdw.astype(jnp.bfloat16), wdw, sdw, bdw, s)
        np.testing.assert_allclose(np.asarray(got.astype(jnp.float32)),
                                   np.asarray(want.astype(jnp.float32)),
                                   rtol=5e-2, atol=5e-2)

    # Extra coverage: row-padded matmul path (M > tile and not divisible by it).
    xm = jax.random.normal(k4, (1000, 40), jnp.float32)
    wm = jax.random.normal(k5, (40, 72), jnp.float32) / math.sqrt(40.0)
    sm, bmv = _init_bn(k6, 72)
    got = matmul_bn(xm, wm, sm, bmv, relu6=True)
    want = jnp.clip(
        jnp.einsum("mk,kc->mc", xm.astype(jnp.bfloat16), wm.astype(jnp.bfloat16),
                   preferred_element_type=jnp.float32) * sm + bmv, 0.0, 6.0
    ).astype(jnp.bfloat16)
    np.testing.assert_allclose(np.asarray(got.astype(jnp.float32)),
                               np.asarray(want.astype(jnp.float32)),
                               rtol=5e-2, atol=5e-2)
    jax.block_until_ready(got)

    print("KERNEL_OK")
</pallas_src>

<mosaic_0001>
module attributes {stable_mosaic.version = 11 : i64} {
  func.func @_mm_bn_act_kernel(%arg0: i32, %arg1: memref<512x32xbf16, #tpu.memory_space<vmem>>, %arg2: memref<32x32xbf16, #tpu.memory_space<vmem>>, %arg3: memref<1x32xf32, #tpu.memory_space<vmem>>, %arg4: memref<1x32xf32, #tpu.memory_space<vmem>>, %arg5: memref<512x32xbf16, #tpu.memory_space<vmem>>) attributes {dimension_semantics = [#tpu.dimension_semantics<parallel>], iteration_bounds = array<i64: 1>, scalar_prefetch = 0 : i64, scratch_operands = 0 : i64, tpu.core_type = #tpu.core_type<tc>, window_params = [{transform_indices = @transform_0, window_bounds = array<i64: 512, 32>}, {pipeline_mode = #tpu.pipeline_mode<synchronous>, transform_indices = @transform_1, window_bounds = array<i64: 32, 32>}, {pipeline_mode = #tpu.pipeline_mode<synchronous>, transform_indices = @transform_2, window_bounds = array<i64: 1, 32>}, {pipeline_mode = #tpu.pipeline_mode<synchronous>, transform_indices = @transform_3, window_bounds = array<i64: 1, 32>}, {transform_indices = @transform_4, window_bounds = array<i64: 512, 32>}]} {
    %c0 = arith.constant 0 : index
    %c0_0 = arith.constant 0 : index
    %0 = vector.load %arg1[%c0, %c0_0] : memref<512x32xbf16, #tpu.memory_space<vmem>>, vector<512x32xbf16>
    %c0_1 = arith.constant 0 : index
    %c0_2 = arith.constant 0 : index
    %1 = vector.load %arg2[%c0_1, %c0_2] : memref<32x32xbf16, #tpu.memory_space<vmem>>, vector<32x32xbf16>
    %cst = arith.constant dense<0.000000e+00> : vector<512x32xf32>
    %2 = tpu.matmul %0, %1, %cst {dimension_numbers = #tpu.dot_dimension_numbers<[1], [0], [0], [1], [0, 0, 1, 1], [], []>} : vector<512x32xbf16>, vector<32x32xbf16>, vector<512x32xf32> -> vector<512x32xf32>
    %c0_3 = arith.constant 0 : index
    %c0_4 = arith.constant 0 : index
    %3 = vector.load %arg3[%c0_3, %c0_4] : memref<1x32xf32, #tpu.memory_space<vmem>>, vector<1x32xf32>
    %4 = vector.broadcast %3 : vector<1x32xf32> to vector<512x32xf32>
    %5 = arith.mulf %2, %4 : vector<512x32xf32>
    %c0_5 = arith.constant 0 : index
    %c0_6 = arith.constant 0 : index
    %6 = vector.load %arg4[%c0_5, %c0_6] : memref<1x32xf32, #tpu.memory_space<vmem>>, vector<1x32xf32>
    %7 = vector.broadcast %6 : vector<1x32xf32> to vector<512x32xf32>
    %8 = arith.addf %5, %7 : vector<512x32xf32>
    %cst_7 = arith.constant 0.000000e+00 : f32
    %cst_8 = arith.constant 6.000000e+00 : f32
    %9 = vector.broadcast %cst_7 : f32 to vector<512x32xf32>
    %10 = arith.maximumf %9, %8 : vector<512x32xf32>
    %11 = vector.broadcast %cst_8 : f32 to vector<512x32xf32>
    %12 = arith.minimumf %11, %10 : vector<512x32xf32>
    %13 = arith.truncf %12 : vector<512x32xf32> to vector<512x32xbf16>
    %c0_9 = arith.constant 0 : index
    %c0_10 = arith.constant 0 : index
    %14 = vector.load %arg5[%c0_9, %c0_10] : memref<512x32xbf16, #tpu.memory_space<vmem>>, vector<512x32xbf16>
    tpu.vector_store %arg5[%c0_9, %c0_10], %13 {strides = array<i32>} : memref<512x32xbf16, #tpu.memory_space<vmem>>, vector<512x32xbf16>,
    return
  }
  func.func @transform_0(%arg0: i32) -> (i32, i32) {
    %c0_i32 = arith.constant 0 : i32
    %c0_i32_0 = arith.constant 0 : i32
    return %arg0, %c0_i32 : i32, i32
  }
  func.func @transform_1(%arg0: i32) -> (i32, i32) {
    %c0_i32 = arith.constant 0 : i32
    %c0_i32_0 = arith.constant 0 : i32
    %c0_i32_1 = arith.constant 0 : i32
    return %c0_i32, %c0_i32_0 : i32, i32
  }
  func.func @transform_2(%arg0: i32) -> (i32, i32) {
    %c0_i32 = arith.constant 0 : i32
    %c0_i32_0 = arith.constant 0 : i32
    %c0_i32_1 = arith.constant 0 : i32
    return %c0_i32, %c0_i32_0 : i32, i32
  }
  func.func @transform_3(%arg0: i32) -> (i32, i32) {
    %c0_i32 = arith.constant 0 : i32
    %c0_i32_0 = arith.constant 0 : i32
    %c0_i32_1 = arith.constant 0 : i32
    return %c0_i32, %c0_i32_0 : i32, i32
  }
  func.func @transform_4(%arg0: i32) -> (i32, i32) {
    %c0_i32 = arith.constant 0 : i32
    %c0_i32_0 = arith.constant 0 : i32
    return %arg0, %c0_i32 : i32, i32
  }
}

</mosaic_0001>

<bundles_post_ra>
// kernel: tpu_custom_call.1
= control target key start
LH: loop header
LB: loop body
LE: loop exit
PB: predicated region body
PF: predicated region fallthrough
CT: control target
= control target key end

     0   :  { %vm258_vm0 = vcmask 261120   ;;  %vm852_vm1 = vcmask 257024   ;;  %s1684_s1 = inlined_call_operand.vmem [shape: bf16[32,32], index: 1, kind: input, shape index: {}]   ;;  %s1685_s0 = inlined_call_operand.vmem [shape: bf16[512,32], index: 0, kind: input, shape index: {}]   ;;  %s1686_s2 = inlined_call_operand.vmem [shape: f32[1,32], index: 2, kind: input, shape index: {}]   ;;  %s1687_s3 = inlined_call_operand.vmem [shape: f32[1,32], index: 3, kind: input, shape index: {}]   ;;  %s1688_s4 = inlined_call_operand.vmem [shape: bf16[512,32], index: 4, kind: output, shape index: {}]  }
   0x1   :  { %v1122_v0 = vld [vmem:[%s1684_s1 + $0x8] sm:$0xff]  ;;  %v1121_v1 = vld [vmem:[%s1684_s1] sm:$0xff]  ;;  %v1091_v10 = vld [vmem:[%s1685_s0 + $0x10] sm:$0xff] }
   0x2   :  { %361 = vmatpush.bf16.msra.mxu0 %v1122_v0  ;;  %1123 = vmatpush.bf16.msra.mxu1 %v1122_v0  ;;  %v1089_v2 = vld [vmem:[%s1685_s0] sm:$0xff]  ;;  %v1090_v6 = vld [vmem:[%s1685_s0 + $0x8] sm:$0xff]  ;;  %v1099_v11 = vld [vmem:[%s1685_s0 + $0x50] sm:$0xff] }
   0x3   :  { %1124 = vmatpush.bf16.msra.mxu2 %v1122_v0  ;;  %1125 = vmatpush.bf16.msra.mxu3 %v1122_v0  ;;  %v1097_v3 = vld [vmem:[%s1685_s0 + $0x40] sm:$0xff]  ;;  %v1098_v7 = vld [vmem:[%s1685_s0 + $0x48] sm:$0xff]  ;;  %v1107_v12 = vld [vmem:[%s1685_s0 + $0x90] sm:$0xff] }
   0x4   :  { %v1105_v4 = vld [vmem:[%s1685_s0 + $0x80] sm:$0xff]  ;;  %v1106_v8 = vld [vmem:[%s1685_s0 + $0x88] sm:$0xff]  ;;  %v1115_v13 = vld [vmem:[%s1685_s0 + $0xd0] sm:$0xff] }
   0x5   :  { %v1113_v5 = vld [vmem:[%s1685_s0 + $0xc0] sm:$0xff]  ;;  %v1114_v9 = vld [vmem:[%s1685_s0 + $0xc8] sm:$0xff]  ;;  %v1092_v14 = vld [vmem:[%s1685_s0 + $0x18] sm:$0xff] }
   0x6   :  { %362 = vmatpush.bf16.msra.mxu0 %v1121_v1  ;;  %1126 = vmatpush.bf16.msra.mxu1 %v1121_v1  ;;  %v1100_v15 = vld [vmem:[%s1685_s0 + $0x58] sm:$0xff]  ;;  %v1093_v18 = vld [vmem:[%s1685_s0 + $0x20] sm:$0xff]  ;;  %v1094_v22 = vld [vmem:[%s1685_s0 + $0x28] sm:$0xff] }
   0x7   :  { %1127 = vmatpush.bf16.msra.mxu2 %v1121_v1  ;;  %1128 = vmatpush.bf16.msra.mxu3 %v1121_v1  ;;  %v1108_v16 = vld [vmem:[%s1685_s0 + $0x98] sm:$0xff]  ;;  %v1101_v19 = vld [vmem:[%s1685_s0 + $0x60] sm:$0xff]  ;;  %v1102_v23 = vld [vmem:[%s1685_s0 + $0x68] sm:$0xff] }
   0x8   :  { %v1116_v17 = vld [vmem:[%s1685_s0 + $0xd8] sm:$0xff]  ;;  %v1109_v20 = vld [vmem:[%s1685_s0 + $0xa0] sm:$0xff]  ;;  %v1110_v24 = vld [vmem:[%s1685_s0 + $0xa8] sm:$0xff] }
   0x9   :  { %1057 = vmatmul.msk.bf16.vlgmr.msra.gmra.mxu0 %vm258_vm0, %v1089_v2  ;;  %1065 = vmatmul.msk.bf16.vlgmr.msra.gmra.mxu1 %vm258_vm0, %v1097_v3  ;;  %v1117_v21 = vld [vmem:[%s1685_s0 + $0xe0] sm:$0xff]  ;;  %v1118_v25 = vld [vmem:[%s1685_s0 + $0xe8] sm:$0xff]  ;;  %v1095_v26 = vld [vmem:[%s1685_s0 + $0x30] sm:$0xff] }
   0xa   :  { %1073 = vmatmul.msk.bf16.vlgmr.msra.gmra.mxu2 %vm258_vm0, %v1105_v4  ;;  %1081 = vmatmul.msk.bf16.vlgmr.msra.gmra.mxu3 %vm258_vm0, %v1113_v5  ;;  %v1103_v27 = vld [vmem:[%s1685_s0 + $0x70] sm:$0xff]  ;;  %v1096_v30 = vld [vmem:[%s1685_s0 + $0x38] sm:$0xff]  ;;  %v1293_v34 = vld [vmem:[%s1686_s2] ss:$0 sm:$0xff] }
   0xb   :  { %v1111_v28 = vld [vmem:[%s1685_s0 + $0xb0] sm:$0xff]  ;;  %v1104_v31 = vld [vmem:[%s1685_s0 + $0x78] sm:$0xff]  ;;  %v1298_v35 = vld [vmem:[%s1687_s3] ss:$0 sm:$0xff] }
   0xc   :  { %v1119_v29 = vld [vmem:[%s1685_s0 + $0xf0] sm:$0xff]  ;;  %v1112_v32 = vld [vmem:[%s1685_s0 + $0xb8] sm:$0xff] }
   0xd   :  { %v1120_v33 = vld [vmem:[%s1685_s0 + $0xf8] sm:$0xff] }
  0x19   :  { %1058 = vmatmul.msk.bf16.gmra.mxu0 %vm258_vm0, %v1090_v6  ;;  %1066 = vmatmul.msk.bf16.gmra.mxu1 %vm258_vm0, %v1098_v7 }
  0x1a   :  { %1074 = vmatmul.msk.bf16.gmra.mxu2 %vm258_vm0, %v1106_v8  ;;  %1082 = vmatmul.msk.bf16.gmra.mxu3 %vm258_vm0, %v1114_v9 }
  0x29   :  { %1059 = vmatmul.msk.bf16.gmra.mxu0 %vm258_vm0, %v1091_v10  ;;  %1067 = vmatmul.msk.bf16.gmra.mxu1 %vm258_vm0, %v1099_v11 }
  0x2a   :  { %1075 = vmatmul.msk.bf16.gmra.mxu2 %vm258_vm0, %v1107_v12  ;;  %1083 = vmatmul.msk.bf16.gmra.mxu3 %vm258_vm0, %v1115_v13 }
  0x39   :  { %1060 = vmatmul.msk.bf16.gmra.mxu0 %vm258_vm0, %v1092_v14  ;;  %1068 = vmatmul.msk.bf16.gmra.mxu1 %vm258_vm0, %v1100_v15 }
  0x3a   :  { %1076 = vmatmul.msk.bf16.gmra.mxu2 %vm258_vm0, %v1108_v16  ;;  %1084 = vmatmul.msk.bf16.gmra.mxu3 %vm258_vm0, %v1116_v17 }
  0x49   :  { %1061 = vmatmul.msk.bf16.gmra.mxu0 %vm258_vm0, %v1093_v18  ;;  %1069 = vmatmul.msk.bf16.gmra.mxu1 %vm258_vm0, %v1101_v19 }
  0x4a   :  { %1077 = vmatmul.msk.bf16.gmra.mxu2 %vm258_vm0, %v1109_v20  ;;  %1085 = vmatmul.msk.bf16.gmra.mxu3 %vm258_vm0, %v1117_v21 }
  0x59   :  { %1062 = vmatmul.msk.bf16.gmra.mxu0 %vm258_vm0, %v1094_v22  ;;  %1070 = vmatmul.msk.bf16.gmra.mxu1 %vm258_vm0, %v1102_v23 }
  0x5a   :  { %1078 = vmatmul.msk.bf16.gmra.mxu2 %vm258_vm0, %v1110_v24  ;;  %1086 = vmatmul.msk.bf16.gmra.mxu3 %vm258_vm0, %v1118_v25 }
  0x69   :  { %1063 = vmatmul.msk.bf16.gmra.mxu0 %vm258_vm0, %v1095_v26  ;;  %1071 = vmatmul.msk.bf16.gmra.mxu1 %vm258_vm0, %v1103_v27 }
  0x6a   :  { %1079 = vmatmul.msk.bf16.gmra.mxu2 %vm258_vm0, %v1111_v28  ;;  %1087 = vmatmul.msk.bf16.gmra.mxu3 %vm258_vm0, %v1119_v29 }
  0x79   :  { %1064 = vmatmul.msk.bf16.gmra.mxu0 %vm258_vm0, %v1096_v30  ;;  %1072 = vmatmul.msk.bf16.gmra.mxu1 %vm258_vm0, %v1104_v31 }
  0x7a   :  { %1080 = vmatmul.msk.bf16.gmra.mxu2 %vm258_vm0, %v1112_v32  ;;  %1088 = vmatmul.msk.bf16.gmra.mxu3 %vm258_vm0, %v1120_v33 }
  0x86   :  { %v364_v36 = vpop.f32.mrf.mxu0  ;;  %v404_v37 = vpop.f32.mrf.mxu1 }
  0x87   :  { %v528_v38 = vmul.f32 %v1293_v34, %v364_v36  ;;  %v544_v39 = vmul.f32 %v1293_v34, %v404_v37 }
  0x89   :  { %v596_v40 = vadd.f32 %v1298_v35, %v528_v38  ;;  %v612_v41 = vadd.f32 %v1298_v35, %v544_v39 }
  0x8b   :  { %v660_v42 = vmax.f32 %v596_v40, 0.0  ;;  %v676_v43 = vmax.f32 %v612_v41, 0.0 }
  0x8d   :  { %v724_v44 = vmin.f32 %v660_v42, 6.0  ;;  %v740_v45 = vmin.f32 %v676_v43, 6.0  ;;  %v444_v46 = vpop.f32.mrf.mxu2  ;;  %v484_v47 = vpop.f32.mrf.mxu3 }
  0x8e   :  { %v560_v48 = vmul.f32 %v1293_v34, %v444_v46  ;;  %v576_v49 = vmul.f32 %v1293_v34, %v484_v47  ;;  %v366_v50 = vpop.f32.mrf.mxu0  ;;  %v406_v51 = vpop.f32.mrf.mxu1 }
  0x8f   :  { %v788_v52 = vpack.c.bf16 %v724_v44, %v724_v44  ;;  %v804_v53 = vpack.c.bf16 %v740_v45, %v740_v45  ;;  %v529_v54 = vmul.f32 %v1293_v34, %v366_v50  ;;  %v545_v55 = vmul.f32 %v1293_v34, %v406_v51 }
  0x90   :  { %v628_v56 = vadd.f32 %v1298_v35, %v560_v48  ;;  %v644_v57 = vadd.f32 %v1298_v35, %v576_v49 }
  0x91   :  { %853 = vst.msk [vmem:[%s1688_s4] sm:$0xf] %vm852_vm1, %v788_v52  ;;  %v597_v58 = vadd.f32 %v1298_v35, %v529_v54  ;;  %v613_v59 = vadd.f32 %v1298_v35, %v545_v55 }
  0x92   :  { %869 = vst.msk [vmem:[%s1688_s4 + $0x40] sm:$0xf] %vm852_vm1, %v804_v53  ;;  %v692_v60 = vmax.f32 %v628_v56, 0.0  ;;  %v708_v61 = vmax.f32 %v644_v57, 0.0 }
  0x93   :  { %v661_v62 = vmax.f32 %v597_v58, 0.0  ;;  %v677_v63 = vmax.f32 %v613_v59, 0.0 }
  0x94   :  { %v756_v0 = vmin.f32 %v692_v60, 6.0  ;;  %v772_v1 = vmin.f32 %v708_v61, 6.0 }
  0x95   :  { %v725_v2 = vmin.f32 %v661_v62, 6.0  ;;  %v741_v3 = vmin.f32 %v677_v63, 6.0  ;;  %v446_v4 = vpop.f32.mrf.mxu2  ;;  %v486_v5 = vpop.f32.mrf.mxu3 }
  0x96   :  { %v820_v6 = vpack.c.bf16 %v756_v0, %v756_v0  ;;  %v836_v7 = vpack.c.bf16 %v772_v1, %v772_v1  ;;  %v561_v8 = vmul.f32 %v1293_v34, %v446_v4  ;;  %v577_v9 = vmul.f32 %v1293_v34, %v486_v5  ;;  %v369_v10 = vpop.f32.mrf.mxu0  ;;  %v409_v11 = vpop.f32.mrf.mxu1 }
  0x97   :  { %v789_v12 = vpack.c.bf16 %v725_v2, %v725_v2  ;;  %v805_v13 = vpack.c.bf16 %v741_v3, %v741_v3  ;;  %v530_v14 = vmul.f32 %v1293_v34, %v369_v10  ;;  %v546_v15 = vmul.f32 %v1293_v34, %v409_v11 }
  0x98   :  { %885 = vst.msk [vmem:[%s1688_s4 + $0x80] sm:$0xf] %vm852_vm1, %v820_v6  ;;  %v629_v16 = vadd.f32 %v1298_v35, %v561_v8  ;;  %v645_v17 = vadd.f32 %v1298_v35, %v577_v9 }
  0x99   :  { %901 = vst.msk [vmem:[%s1688_s4 + $0xc0] sm:$0xf] %vm852_vm1, %v836_v7  ;;  %v598_v18 = vadd.f32 %v1298_v35, %v530_v14  ;;  %v614_v19 = vadd.f32 %v1298_v35, %v546_v15 }
  0x9a   :  { %854 = vst.msk [vmem:[%s1688_s4 + $0x4] sm:$0xf] %vm852_vm1, %v789_v12  ;;  %v693_v20 = vmax.f32 %v629_v16, 0.0  ;;  %v709_v21 = vmax.f32 %v645_v17, 0.0 }
  0x9b   :  { %870 = vst.msk [vmem:[%s1688_s4 + $0x44] sm:$0xf] %vm852_vm1, %v805_v13  ;;  %v662_v22 = vmax.f32 %v598_v18, 0.0  ;;  %v678_v23 = vmax.f32 %v614_v19, 0.0 }
  0x9c   :  { %v757_v24 = vmin.f32 %v693_v20, 6.0  ;;  %v773_v25 = vmin.f32 %v709_v21, 6.0 }
  0x9d   :  { %v726_v26 = vmin.f32 %v662_v22, 6.0  ;;  %v742_v27 = vmin.f32 %v678_v23, 6.0  ;;  %v449_v28 = vpop.f32.mrf.mxu2  ;;  %v489_v29 = vpop.f32.mrf.mxu3 }
  0x9e   :  { %v821_v30 = vpack.c.bf16 %v757_v24, %v757_v24  ;;  %v837_v31 = vpack.c.bf16 %v773_v25, %v773_v25  ;;  %v562_v32 = vmul.f32 %v1293_v34, %v449_v28  ;;  %v578_v33 = vmul.f32 %v1293_v34, %v489_v29  ;;  %v371_v36 = vpop.f32.mrf.mxu0  ;;  %v411_v37 = vpop.f32.mrf.mxu1 }
  0x9f   :  { %v790_v38 = vpack.c.bf16 %v726_v26, %v726_v26  ;;  %v806_v39 = vpack.c.bf16 %v742_v27, %v742_v27  ;;  %v531_v40 = vmul.f32 %v1293_v34, %v371_v36  ;;  %v547_v41 = vmul.f32 %v1293_v34, %v411_v37 }
  0xa0   :  { %886 = vst.msk [vmem:[%s1688_s4 + $0x84] sm:$0xf] %vm852_vm1, %v821_v30  ;;  %v630_v42 = vadd.f32 %v1298_v35, %v562_v32  ;;  %v646_v43 = vadd.f32 %v1298_v35, %v578_v33 }
  0xa1   :  { %902 = vst.msk [vmem:[%s1688_s4 + $0xc4] sm:$0xf] %vm852_vm1, %v837_v31  ;;  %v599_v44 = vadd.f32 %v1298_v35, %v531_v40  ;;  %v615_v45 = vadd.f32 %v1298_v35, %v547_v41 }
  0xa2   :  { %855 = vst.msk [vmem:[%s1688_s4 + $0x8] sm:$0xf] %vm852_vm1, %v790_v38  ;;  %v694_v46 = vmax.f32 %v630_v42, 0.0  ;;  %v710_v47 = vmax.f32 %v646_v43, 0.0 }
  0xa3   :  { %871 = vst.msk [vmem:[%s1688_s4 + $0x48] sm:$0xf] %vm852_vm1, %v806_v39  ;;  %v663_v48 = vmax.f32 %v599_v44, 0.0  ;;  %v679_v49 = vmax.f32 %v615_v45, 0.0 }
  0xa4   :  { %v758_v50 = vmin.f32 %v694_v46, 6.0  ;;  %v774_v51 = vmin.f32 %v710_v47, 6.0 }
  0xa5   :  { %v727_v52 = vmin.f32 %v663_v48, 6.0  ;;  %v743_v53 = vmin.f32 %v679_v49, 6.0  ;;  %v451_v54 = vpop.f32.mrf.mxu2  ;;  %v491_v55 = vpop.f32.mrf.mxu3 }
  0xa6   :  { %v822_v56 = vpack.c.bf16 %v758_v50, %v758_v50  ;;  %v838_v57 = vpack.c.bf16 %v774_v51, %v774_v51  ;;  %v563_v58 = vmul.f32 %v1293_v34, %v451_v54  ;;  %v579_v59 = vmul.f32 %v1293_v34, %v491_v55  ;;  %v374_v60 = vpop.f32.mrf.mxu0  ;;  %v414_v61 = vpop.f32.mrf.mxu1 }
  0xa7   :  { %v791_v62 = vpack.c.bf16 %v727_v52, %v727_v52  ;;  %v807_v63 = vpack.c.bf16 %v743_v53, %v743_v53  ;;  %v532_v0 = vmul.f32 %v1293_v34, %v374_v60  ;;  %v548_v1 = vmul.f32 %v1293_v34, %v414_v61 }
  0xa8   :  { %887 = vst.msk [vmem:[%s1688_s4 + $0x88] sm:$0xf] %vm852_vm1, %v822_v56  ;;  %v631_v2 = vadd.f32 %v1298_v35, %v563_v58  ;;  %v647_v3 = vadd.f32 %v1298_v35, %v579_v59 }
  0xa9   :  { %903 = vst.msk [vmem:[%s1688_s4 + $0xc8] sm:$0xf] %vm852_vm1, %v838_v57  ;;  %v600_v4 = vadd.f32 %v1298_v35, %v532_v0  ;;  %v616_v5 = vadd.f32 %v1298_v35, %v548_v1 }
  0xaa   :  { %856 = vst.msk [vmem:[%s1688_s4 + $0xc] sm:$0xf] %vm852_vm1, %v791_v62  ;;  %v695_v6 = vmax.f32 %v631_v2, 0.0  ;;  %v711_v7 = vmax.f32 %v647_v3, 0.0 }
  0xab   :  { %872 = vst.msk [vmem:[%s1688_s4 + $0x4c] sm:$0xf] %vm852_vm1, %v807_v63  ;;  %v664_v8 = vmax.f32 %v600_v4, 0.0  ;;  %v680_v9 = vmax.f32 %v616_v5, 0.0 }
  0xac   :  { %v759_v10 = vmin.f32 %v695_v6, 6.0  ;;  %v775_v11 = vmin.f32 %v711_v7, 6.0 }
  0xad   :  { %v728_v12 = vmin.f32 %v664_v8, 6.0  ;;  %v744_v13 = vmin.f32 %v680_v9, 6.0  ;;  %v454_v14 = vpop.f32.mrf.mxu2  ;;  %v494_v15 = vpop.f32.mrf.mxu3 }
  0xae   :  { %v823_v16 = vpack.c.bf16 %v759_v10, %v759_v10  ;;  %v839_v17 = vpack.c.bf16 %v775_v11, %v775_v11  ;;  %v564_v18 = vmul.f32 %v1293_v34, %v454_v14  ;;  %v580_v19 = vmul.f32 %v1293_v34, %v494_v15  ;;  %v376_v20 = vpop.f32.mrf.mxu0  ;;  %v416_v21 = vpop.f32.mrf.mxu1 }
  0xaf   :  { %v792_v22 = vpack.c.bf16 %v728_v12, %v728_v12  ;;  %v808_v23 = vpack.c.bf16 %v744_v13, %v744_v13  ;;  %v533_v24 = vmul.f32 %v1293_v34, %v376_v20  ;;  %v549_v25 = vmul.f32 %v1293_v34, %v416_v21 }
  0xb0   :  { %888 = vst.msk [vmem:[%s1688_s4 + $0x8c] sm:$0xf] %vm852_vm1, %v823_v16  ;;  %v632_v26 = vadd.f32 %v1298_v35, %v564_v18  ;;  %v648_v27 = vadd.f32 %v1298_v35, %v580_v19 }
  0xb1   :  { %904 = vst.msk [vmem:[%s1688_s4 + $0xcc] sm:$0xf] %vm852_vm1, %v839_v17  ;;  %v601_v28 = vadd.f32 %v1298_v35, %v533_v24  ;;  %v617_v29 = vadd.f32 %v1298_v35, %v549_v25 }
  0xb2   :  { %857 = vst.msk [vmem:[%s1688_s4 + $0x10] sm:$0xf] %vm852_vm1, %v792_v22  ;;  %v696_v30 = vmax.f32 %v632_v26, 0.0  ;;  %v712_v31 = vmax.f32 %v648_v27, 0.0 }
  0xb3   :  { %873 = vst.msk [vmem:[%s1688_s4 + $0x50] sm:$0xf] %vm852_vm1, %v808_v23  ;;  %v665_v32 = vmax.f32 %v601_v28, 0.0  ;;  %v681_v33 = vmax.f32 %v617_v29, 0.0 }
  0xb4   :  { %v760_v36 = vmin.f32 %v696_v30, 6.0  ;;  %v776_v37 = vmin.f32 %v712_v31, 6.0 }
  0xb5   :  { %v729_v38 = vmin.f32 %v665_v32, 6.0  ;;  %v745_v39 = vmin.f32 %v681_v33, 6.0  ;;  %v456_v40 = vpop.f32.mrf.mxu2  ;;  %v496_v41 = vpop.f32.mrf.mxu3 }
  0xb6   :  { %v824_v42 = vpack.c.bf16 %v760_v36, %v760_v36  ;;  %v840_v43 = vpack.c.bf16 %v776_v37, %v776_v37  ;;  %v565_v44 = vmul.f32 %v1293_v34, %v456_v40  ;;  %v581_v45 = vmul.f32 %v1293_v34, %v496_v41  ;;  %v379_v46 = vpop.f32.mrf.mxu0  ;;  %v419_v47 = vpop.f32.mrf.mxu1 }
  0xb7   :  { %v793_v48 = vpack.c.bf16 %v729_v38, %v729_v38  ;;  %v809_v49 = vpack.c.bf16 %v745_v39, %v745_v39  ;;  %v534_v50 = vmul.f32 %v1293_v34, %v379_v46  ;;  %v550_v51 = vmul.f32 %v1293_v34, %v419_v47 }
  0xb8   :  { %889 = vst.msk [vmem:[%s1688_s4 + $0x90] sm:$0xf] %vm852_vm1, %v824_v42  ;;  %v633_v52 = vadd.f32 %v1298_v35, %v565_v44  ;;  %v649_v53 = vadd.f32 %v1298_v35, %v581_v45 }
  0xb9   :  { %905 = vst.msk [vmem:[%s1688_s4 + $0xd0] sm:$0xf] %vm852_vm1, %v840_v43  ;;  %v602_v54 = vadd.f32 %v1298_v35, %v534_v50  ;;  %v618_v55 = vadd.f32 %v1298_v35, %v550_v51 }
  0xba   :  { %858 = vst.msk [vmem:[%s1688_s4 + $0x14] sm:$0xf] %vm852_vm1, %v793_v48  ;;  %v697_v56 = vmax.f32 %v633_v52, 0.0  ;;  %v713_v57 = vmax.f32 %v649_v53, 0.0 }
  0xbb   :  { %874 = vst.msk [vmem:[%s1688_s4 + $0x54] sm:$0xf] %vm852_vm1, %v809_v49  ;;  %v666_v58 = vmax.f32 %v602_v54, 0.0  ;;  %v682_v59 = vmax.f32 %v618_v55, 0.0 }
  0xbc   :  { %v761_v60 = vmin.f32 %v697_v56, 6.0  ;;  %v777_v61 = vmin.f32 %v713_v57, 6.0 }
  0xbd   :  { %v730_v62 = vmin.f32 %v666_v58, 6.0  ;;  %v746_v63 = vmin.f32 %v682_v59, 6.0  ;;  %v459_v0 = vpop.f32.mrf.mxu2  ;;  %v499_v1 = vpop.f32.mrf.mxu3 }
  0xbe   :  { %v825_v2 = vpack.c.bf16 %v761_v60, %v761_v60  ;;  %v841_v3 = vpack.c.bf16 %v777_v61, %v777_v61  ;;  %v566_v4 = vmul.f32 %v1293_v34, %v459_v0  ;;  %v582_v5 = vmul.f32 %v1293_v34, %v499_v1  ;;  %v381_v6 = vpop.f32.mrf.mxu0  ;;  %v421_v7 = vpop.f32.mrf.mxu1 }
  0xbf   :  { %v794_v8 = vpack.c.bf16 %v730_v62, %v730_v62  ;;  %v810_v9 = vpack.c.bf16 %v746_v63, %v746_v63  ;;  %v535_v10 = vmul.f32 %v1293_v34, %v381_v6  ;;  %v551_v11 = vmul.f32 %v1293_v34, %v421_v7 }
  0xc0   :  { %890 = vst.msk [vmem:[%s1688_s4 + $0x94] sm:$0xf] %vm852_vm1, %v825_v2  ;;  %v634_v12 = vadd.f32 %v1298_v35, %v566_v4  ;;  %v650_v13 = vadd.f32 %v1298_v35, %v582_v5 }
  0xc1   :  { %906 = vst.msk [vmem:[%s1688_s4 + $0xd4] sm:$0xf] %vm852_vm1, %v841_v3  ;;  %v603_v14 = vadd.f32 %v1298_v35, %v535_v10  ;;  %v619_v15 = vadd.f32 %v1298_v35, %v551_v11 }
  0xc2   :  { %859 = vst.msk [vmem:[%s1688_s4 + $0x18] sm:$0xf] %vm852_vm1, %v794_v8  ;;  %v698_v16 = vmax.f32 %v634_v12, 0.0  ;;  %v714_v17 = vmax.f32 %v650_v13, 0.0 }
  0xc3   :  { %875 = vst.msk [vmem:[%s1688_s4 + $0x58] sm:$0xf] %vm852_vm1, %v810_v9  ;;  %v667_v18 = vmax.f32 %v603_v14, 0.0  ;;  %v683_v19 = vmax.f32 %v619_v15, 0.0 }
  0xc4   :  { %v762_v20 = vmin.f32 %v698_v16, 6.0  ;;  %v778_v21 = vmin.f32 %v714_v17, 6.0 }
  0xc5   :  { %v731_v22 = vmin.f32 %v667_v18, 6.0  ;;  %v747_v23 = vmin.f32 %v683_v19, 6.0  ;;  %v461_v24 = vpop.f32.mrf.mxu2  ;;  %v501_v25 = vpop.f32.mrf.mxu3 }
  0xc6   :  { %v826_v26 = vpack.c.bf16 %v762_v20, %v762_v20  ;;  %v842_v27 = vpack.c.bf16 %v778_v21, %v778_v21  ;;  %v567_v28 = vmul.f32 %v1293_v34, %v461_v24  ;;  %v583_v29 = vmul.f32 %v1293_v34, %v501_v25  ;;  %v384_v30 = vpop.f32.mrf.mxu0  ;;  %v424_v31 = vpop.f32.mrf.mxu1 }
  0xc7   :  { %v795_v32 = vpack.c.bf16 %v731_v22, %v731_v22  ;;  %v811_v33 = vpack.c.bf16 %v747_v23, %v747_v23  ;;  %v536_v36 = vmul.f32 %v1293_v34, %v384_v30  ;;  %v552_v37 = vmul.f32 %v1293_v34, %v424_v31 }
  0xc8   :  { %891 = vst.msk [vmem:[%s1688_s4 + $0x98] sm:$0xf] %vm852_vm1, %v826_v26  ;;  %v635_v38 = vadd.f32 %v1298_v35, %v567_v28  ;;  %v651_v39 = vadd.f32 %v1298_v35, %v583_v29 }
  0xc9   :  { %907 = vst.msk [vmem:[%s1688_s4 + $0xd8] sm:$0xf] %vm852_vm1, %v842_v27  ;;  %v604_v40 = vadd.f32 %v1298_v35, %v536_v36  ;;  %v620_v41 = vadd.f32 %v1298_v35, %v552_v37 }
  0xca   :  { %860 = vst.msk [vmem:[%s1688_s4 + $0x1c] sm:$0xf] %vm852_vm1, %v795_v32  ;;  %v699_v42 = vmax.f32 %v635_v38, 0.0  ;;  %v715_v43 = vmax.f32 %v651_v39, 0.0 }
  0xcb   :  { %876 = vst.msk [vmem:[%s1688_s4 + $0x5c] sm:$0xf] %vm852_vm1, %v811_v33  ;;  %v668_v44 = vmax.f32 %v604_v40, 0.0  ;;  %v684_v45 = vmax.f32 %v620_v41, 0.0 }
  0xcc   :  { %v763_v46 = vmin.f32 %v699_v42, 6.0  ;;  %v779_v47 = vmin.f32 %v715_v43, 6.0 }
  0xcd   :  { %v732_v48 = vmin.f32 %v668_v44, 6.0  ;;  %v748_v49 = vmin.f32 %v684_v45, 6.0  ;;  %v464_v50 = vpop.f32.mrf.mxu2  ;;  %v504_v51 = vpop.f32.mrf.mxu3 }
  0xce   :  { %v827_v52 = vpack.c.bf16 %v763_v46, %v763_v46  ;;  %v843_v53 = vpack.c.bf16 %v779_v47, %v779_v47  ;;  %v568_v54 = vmul.f32 %v1293_v34, %v464_v50  ;;  %v584_v55 = vmul.f32 %v1293_v34, %v504_v51  ;;  %v386_v56 = vpop.f32.mrf.mxu0  ;;  %v426_v57 = vpop.f32.mrf.mxu1 }
  0xcf   :  { %v796_v58 = vpack.c.bf16 %v732_v48, %v732_v48  ;;  %v812_v59 = vpack.c.bf16 %v748_v49, %v748_v49  ;;  %v537_v60 = vmul.f32 %v1293_v34, %v386_v56  ;;  %v553_v61 = vmul.f32 %v1293_v34, %v426_v57 }
  0xd0   :  { %892 = vst.msk [vmem:[%s1688_s4 + $0x9c] sm:$0xf] %vm852_vm1, %v827_v52  ;;  %v636_v62 = vadd.f32 %v1298_v35, %v568_v54  ;;  %v652_v63 = vadd.f32 %v1298_v35, %v584_v55 }
  0xd1   :  { %908 = vst.msk [vmem:[%s1688_s4 + $0xdc] sm:$0xf] %vm852_vm1, %v843_v53  ;;  %v605_v0 = vadd.f32 %v1298_v35, %v537_v60  ;;  %v621_v1 = vadd.f32 %v1298_v35, %v553_v61 }
  0xd2   :  { %861 = vst.msk [vmem:[%s1688_s4 + $0x20] sm:$0xf] %vm852_vm1, %v796_v58  ;;  %v700_v2 = vmax.f32 %v636_v62, 0.0  ;;  %v716_v3 = vmax.f32 %v652_v63, 0.0 }
  0xd3   :  { %877 = vst.msk [vmem:[%s1688_s4 + $0x60] sm:$0xf] %vm852_vm1, %v812_v59  ;;  %v669_v4 = vmax.f32 %v605_v0, 0.0  ;;  %v685_v5 = vmax.f32 %v621_v1, 0.0 }
  0xd4   :  { %v764_v6 = vmin.f32 %v700_v2, 6.0  ;;  %v780_v7 = vmin.f32 %v716_v3, 6.0 }
  0xd5   :  { %v733_v8 = vmin.f32 %v669_v4, 6.0  ;;  %v749_v9 = vmin.f32 %v685_v5, 6.0  ;;  %v466_v10 = vpop.f32.mrf.mxu2  ;;  %v506_v11 = vpop.f32.mrf.mxu3 }
  0xd6   :  { %v828_v12 = vpack.c.bf16 %v764_v6, %v764_v6  ;;  %v844_v13 = vpack.c.bf16 %v780_v7, %v780_v7  ;;  %v569_v14 = vmul.f32 %v1293_v34, %v466_v10  ;;  %v585_v15 = vmul.f32 %v1293_v34, %v506_v11  ;;  %v389_v16 = vpop.f32.mrf.mxu0  ;;  %v429_v17 = vpop.f32.mrf.mxu1 }
  0xd7   :  { %v797_v18 = vpack.c.bf16 %v733_v8, %v733_v8  ;;  %v813_v19 = vpack.c.bf16 %v749_v9, %v749_v9  ;;  %v538_v20 = vmul.f32 %v1293_v34, %v389_v16  ;;  %v554_v21 = vmul.f32 %v1293_v34, %v429_v17 }
  0xd8   :  { %893 = vst.msk [vmem:[%s1688_s4 + $0xa0] sm:$0xf] %vm852_vm1, %v828_v12  ;;  %v637_v22 = vadd.f32 %v1298_v35, %v569_v14  ;;  %v653_v23 = vadd.f32 %v1298_v35, %v585_v15 }
  0xd9   :  { %909 = vst.msk [vmem:[%s1688_s4 + $0xe0] sm:$0xf] %vm852_vm1, %v844_v13  ;;  %v606_v24 = vadd.f32 %v1298_v35, %v538_v20  ;;  %v622_v25 = vadd.f32 %v1298_v35, %v554_v21 }
  0xda   :  { %862 = vst.msk [vmem:[%s1688_s4 + $0x24] sm:$0xf] %vm852_vm1, %v797_v18  ;;  %v701_v26 = vmax.f32 %v637_v22, 0.0  ;;  %v717_v27 = vmax.f32 %v653_v23, 0.0 }
  0xdb   :  { %878 = vst.msk [vmem:[%s1688_s4 + $0x64] sm:$0xf] %vm852_vm1, %v813_v19  ;;  %v670_v28 = vmax.f32 %v606_v24, 0.0  ;;  %v686_v29 = vmax.f32 %v622_v25, 0.0 }
  0xdc   :  { %v765_v30 = vmin.f32 %v701_v26, 6.0  ;;  %v781_v31 = vmin.f32 %v717_v27, 6.0 }
  0xdd   :  { %v734_v32 = vmin.f32 %v670_v28, 6.0  ;;  %v750_v33 = vmin.f32 %v686_v29, 6.0  ;;  %v469_v36 = vpop.f32.mrf.mxu2  ;;  %v509_v37 = vpop.f32.mrf.mxu3 }
  0xde   :  { %v829_v38 = vpack.c.bf16 %v765_v30, %v765_v30  ;;  %v845_v39 = vpack.c.bf16 %v781_v31, %v781_v31  ;;  %v570_v40 = vmul.f32 %v1293_v34, %v469_v36  ;;  %v586_v41 = vmul.f32 %v1293_v34, %v509_v37  ;;  %v391_v42 = vpop.f32.mrf.mxu0  ;;  %v431_v43 = vpop.f32.mrf.mxu1 }
  0xdf   :  { %v798_v44 = vpack.c.bf16 %v734_v32, %v734_v32  ;;  %v814_v45 = vpack.c.bf16 %v750_v33, %v750_v33  ;;  %v539_v46 = vmul.f32 %v1293_v34, %v391_v42  ;;  %v555_v47 = vmul.f32 %v1293_v34, %v431_v43 }
  0xe0   :  { %894 = vst.msk [vmem:[%s1688_s4 + $0xa4] sm:$0xf] %vm852_vm1, %v829_v38  ;;  %v638_v48 = vadd.f32 %v1298_v35, %v570_v40  ;;  %v654_v49 = vadd.f32 %v1298_v35, %v586_v41 }
  0xe1   :  { %910 = vst.msk [vmem:[%s1688_s4 + $0xe4] sm:$0xf] %vm852_vm1, %v845_v39  ;;  %v607_v50 = vadd.f32 %v1298_v35, %v539_v46  ;;  %v623_v51 = vadd.f32 %v1298_v35, %v555_v47 }
  0xe2   :  { %863 = vst.msk [vmem:[%s1688_s4 + $0x28] sm:$0xf] %vm852_vm1, %v798_v44  ;;  %v702_v52 = vmax.f32 %v638_v48, 0.0  ;;  %v718_v53 = vmax.f32 %v654_v49, 0.0 }
  0xe3   :  { %879 = vst.msk [vmem:[%s1688_s4 + $0x68] sm:$0xf] %vm852_vm1, %v814_v45  ;;  %v671_v54 = vmax.f32 %v607_v50, 0.0  ;;  %v687_v55 = vmax.f32 %v623_v51, 0.0 }
  0xe4   :  { %v766_v56 = vmin.f32 %v702_v52, 6.0  ;;  %v782_v57 = vmin.f32 %v718_v53, 6.0 }
  0xe5   :  { %v735_v58 = vmin.f32 %v671_v54, 6.0  ;;  %v751_v59 = vmin.f32 %v687_v55, 6.0  ;;  %v471_v60 = vpop.f32.mrf.mxu2  ;;  %v511_v61 = vpop.f32.mrf.mxu3 }
  0xe6   :  { %v830_v62 = vpack.c.bf16 %v766_v56, %v766_v56  ;;  %v846_v63 = vpack.c.bf16 %v782_v57, %v782_v57  ;;  %v571_v0 = vmul.f32 %v1293_v34, %v471_v60  ;;  %v587_v1 = vmul.f32 %v1293_v34, %v511_v61  ;;  %v394_v2 = vpop.f32.mrf.mxu0  ;;  %v434_v3 = vpop.f32.mrf.mxu1 }
  0xe7   :  { %v799_v4 = vpack.c.bf16 %v735_v58, %v735_v58  ;;  %v815_v5 = vpack.c.bf16 %v751_v59, %v751_v59  ;;  %v540_v6 = vmul.f32 %v1293_v34, %v394_v2  ;;  %v556_v7 = vmul.f32 %v1293_v34, %v434_v3 }
  0xe8   :  { %895 = vst.msk [vmem:[%s1688_s4 + $0xa8] sm:$0xf] %vm852_vm1, %v830_v62  ;;  %v639_v8 = vadd.f32 %v1298_v35, %v571_v0  ;;  %v655_v9 = vadd.f32 %v1298_v35, %v587_v1 }
  0xe9   :  { %911 = vst.msk [vmem:[%s1688_s4 + $0xe8] sm:$0xf] %vm852_vm1, %v846_v63  ;;  %v608_v10 = vadd.f32 %v1298_v35, %v540_v6  ;;  %v624_v11 = vadd.f32 %v1298_v35, %v556_v7 }
  0xea   :  { %864 = vst.msk [vmem:[%s1688_s4 + $0x2c] sm:$0xf] %vm852_vm1, %v799_v4  ;;  %v703_v12 = vmax.f32 %v639_v8, 0.0  ;;  %v719_v13 = vmax.f32 %v655_v9, 0.0 }
  0xeb   :  { %880 = vst.msk [vmem:[%s1688_s4 + $0x6c] sm:$0xf] %vm852_vm1, %v815_v5  ;;  %v672_v14 = vmax.f32 %v608_v10, 0.0  ;;  %v688_v15 = vmax.f32 %v624_v11, 0.0 }
  0xec   :  { %v767_v16 = vmin.f32 %v703_v12, 6.0  ;;  %v783_v17 = vmin.f32 %v719_v13, 6.0 }
  0xed   :  { %v736_v18 = vmin.f32 %v672_v14, 6.0  ;;  %v752_v19 = vmin.f32 %v688_v15, 6.0  ;;  %v474_v20 = vpop.f32.mrf.mxu2  ;;  %v514_v21 = vpop.f32.mrf.mxu3 }
  0xee   :  { %v831_v22 = vpack.c.bf16 %v767_v16, %v767_v16  ;;  %v847_v23 = vpack.c.bf16 %v783_v17, %v783_v17  ;;  %v572_v24 = vmul.f32 %v1293_v34, %v474_v20  ;;  %v588_v25 = vmul.f32 %v1293_v34, %v514_v21  ;;  %v396_v26 = vpop.f32.mrf.mxu0  ;;  %v436_v27 = vpop.f32.mrf.mxu1 }
  0xef   :  { %v800_v28 = vpack.c.bf16 %v736_v18, %v736_v18  ;;  %v816_v29 = vpack.c.bf16 %v752_v19, %v752_v19  ;;  %v541_v30 = vmul.f32 %v1293_v34, %v396_v26  ;;  %v557_v31 = vmul.f32 %v1293_v34, %v436_v27 }
  0xf0   :  { %896 = vst.msk [vmem:[%s1688_s4 + $0xac] sm:$0xf] %vm852_vm1, %v831_v22  ;;  %v640_v32 = vadd.f32 %v1298_v35, %v572_v24  ;;  %v656_v33 = vadd.f32 %v1298_v35, %v588_v25 }
  0xf1   :  { %912 = vst.msk [vmem:[%s1688_s4 + $0xec] sm:$0xf] %vm852_vm1, %v847_v23  ;;  %v609_v36 = vadd.f32 %v1298_v35, %v541_v30  ;;  %v625_v37 = vadd.f32 %v1298_v35, %v557_v31 }
  0xf2   :  { %865 = vst.msk [vmem:[%s1688_s4 + $0x30] sm:$0xf] %vm852_vm1, %v800_v28  ;;  %v704_v38 = vmax.f32 %v640_v32, 0.0  ;;  %v720_v39 = vmax.f32 %v656_v33, 0.0 }
  0xf3   :  { %881 = vst.msk [vmem:[%s1688_s4 + $0x70] sm:$0xf] %vm852_vm1, %v816_v29  ;;  %v673_v40 = vmax.f32 %v609_v36, 0.0  ;;  %v689_v41 = vmax.f32 %v625_v37, 0.0 }
  0xf4   :  { %v768_v42 = vmin.f32 %v704_v38, 6.0  ;;  %v784_v43 = vmin.f32 %v720_v39, 6.0 }
  0xf5   :  { %v737_v44 = vmin.f32 %v673_v40, 6.0  ;;  %v753_v45 = vmin.f32 %v689_v41, 6.0  ;;  %v476_v46 = vpop.f32.mrf.mxu2  ;;  %v516_v47 = vpop.f32.mrf.mxu3 }
  0xf6   :  { %v832_v48 = vpack.c.bf16 %v768_v42, %v768_v42  ;;  %v848_v49 = vpack.c.bf16 %v784_v43, %v784_v43  ;;  %v573_v50 = vmul.f32 %v1293_v34, %v476_v46  ;;  %v589_v51 = vmul.f32 %v1293_v34, %v516_v47  ;;  %v399_v52 = vpop.f32.mrf.mxu0  ;;  %v439_v53 = vpop.f32.mrf.mxu1 }
  0xf7   :  { %v801_v54 = vpack.c.bf16 %v737_v44, %v737_v44  ;;  %v817_v55 = vpack.c.bf16 %v753_v45, %v753_v45  ;;  %v542_v56 = vmul.f32 %v1293_v34, %v399_v52  ;;  %v558_v57 = vmul.f32 %v1293_v34, %v439_v53 }
  0xf8   :  { %897 = vst.msk [vmem:[%s1688_s4 + $0xb0] sm:$0xf] %vm852_vm1, %v832_v48  ;;  %v641_v58 = vadd.f32 %v1298_v35, %v573_v50  ;;  %v657_v59 = vadd.f32 %v1298_v35, %v589_v51 }
  0xf9   :  { %913 = vst.msk [vmem:[%s1688_s4 + $0xf0] sm:$0xf] %vm852_vm1, %v848_v49  ;;  %v610_v60 = vadd.f32 %v1298_v35, %v542_v56  ;;  %v626_v61 = vadd.f32 %v1298_v35, %v558_v57 }
  0xfa   :  { %866 = vst.msk [vmem:[%s1688_s4 + $0x34] sm:$0xf] %vm852_vm1, %v801_v54  ;;  %v705_v62 = vmax.f32 %v641_v58, 0.0  ;;  %v721_v63 = vmax.f32 %v657_v59, 0.0 }
  0xfb   :  { %882 = vst.msk [vmem:[%s1688_s4 + $0x74] sm:$0xf] %vm852_vm1, %v817_v55  ;;  %v674_v0 = vmax.f32 %v610_v60, 0.0  ;;  %v690_v1 = vmax.f32 %v626_v61, 0.0 }
  0xfc   :  { %v769_v2 = vmin.f32 %v705_v62, 6.0  ;;  %v785_v3 = vmin.f32 %v721_v63, 6.0 }
  0xfd   :  { %v738_v4 = vmin.f32 %v674_v0, 6.0  ;;  %v754_v5 = vmin.f32 %v690_v1, 6.0  ;;  %v479_v6 = vpop.f32.mrf.mxu2  ;;  %v519_v7 = vpop.f32.mrf.mxu3 }
  0xfe   :  { %v833_v8 = vpack.c.bf16 %v769_v2, %v769_v2  ;;  %v849_v9 = vpack.c.bf16 %v785_v3, %v785_v3  ;;  %v574_v10 = vmul.f32 %v1293_v34, %v479_v6  ;;  %v590_v11 = vmul.f32 %v1293_v34, %v519_v7  ;;  %v401_v12 = vpop.f32.mrf.mxu0  ;;  %v441_v13 = vpop.f32.mrf.mxu1 }
  0xff   :  { %v802_v14 = vpack.c.bf16 %v738_v4, %v738_v4  ;;  %v818_v15 = vpack.c.bf16 %v754_v5, %v754_v5  ;;  %v543_v16 = vmul.f32 %v1293_v34, %v401_v12  ;;  %v559_v17 = vmul.f32 %v1293_v34, %v441_v13 }
 0x100   :  { %898 = vst.msk [vmem:[%s1688_s4 + $0xb4] sm:$0xf] %vm852_vm1, %v833_v8  ;;  %v642_v18 = vadd.f32 %v1298_v35, %v574_v10  ;;  %v658_v19 = vadd.f32 %v1298_v35, %v590_v11 }
 0x101   :  { %914 = vst.msk [vmem:[%s1688_s4 + $0xf4] sm:$0xf] %vm852_vm1, %v849_v9  ;;  %v611_v20 = vadd.f32 %v1298_v35, %v543_v16  ;;  %v627_v21 = vadd.f32 %v1298_v35, %v559_v17 }
 0x102   :  { %867 = vst.msk [vmem:[%s1688_s4 + $0x38] sm:$0xf] %vm852_vm1, %v802_v14  ;;  %v706_v22 = vmax.f32 %v642_v18, 0.0  ;;  %v722_v23 = vmax.f32 %v658_v19, 0.0 }
 0x103   :  { %883 = vst.msk [vmem:[%s1688_s4 + $0x78] sm:$0xf] %vm852_vm1, %v818_v15  ;;  %v675_v24 = vmax.f32 %v611_v20, 0.0  ;;  %v691_v25 = vmax.f32 %v627_v21, 0.0 }
 0x104   :  { %v770_v26 = vmin.f32 %v706_v22, 6.0  ;;  %v786_v27 = vmin.f32 %v722_v23, 6.0 }
 0x105   :  { %v739_v28 = vmin.f32 %v675_v24, 6.0  ;;  %v755_v29 = vmin.f32 %v691_v25, 6.0  ;;  %v481_v30 = vpop.f32.mrf.mxu2  ;;  %v521_v31 = vpop.f32.mrf.mxu3 }
 0x106   :  { %v834_v32 = vpack.c.bf16 %v770_v26, %v770_v26  ;;  %v850_v33 = vpack.c.bf16 %v786_v27, %v786_v27  ;;  %v575_v36 = vmul.f32 %v1293_v34, %v481_v30  ;;  %v591_v37 = vmul.f32 %v1293_v34, %v521_v31 }
 0x107   :  { %v803_v38 = vpack.c.bf16 %v739_v28, %v739_v28  ;;  %v819_v39 = vpack.c.bf16 %v755_v29, %v755_v29 }
 0x108   :  { %899 = vst.msk [vmem:[%s1688_s4 + $0xb8] sm:$0xf] %vm852_vm1, %v834_v32  ;;  %v643_v40 = vadd.f32 %v1298_v35, %v575_v36  ;;  %v659_v41 = vadd.f32 %v1298_v35, %v591_v37 }
 0x109   :  { %915 = vst.msk [vmem:[%s1688_s4 + $0xf8] sm:$0xf] %vm852_vm1, %v850_v33 }
 0x10a   :  { %868 = vst.msk [vmem:[%s1688_s4 + $0x3c] sm:$0xf] %vm852_vm1, %v803_v38  ;;  %v707_v34 = vmax.f32 %v643_v40, 0.0  ;;  %v723_v42 = vmax.f32 %v659_v41, 0.0 }
 0x10b   :  { %884 = vst.msk [vmem:[%s1688_s4 + $0x7c] sm:$0xf] %vm852_vm1, %v819_v39 }
 0x10c   :  { %v771_v43 = vmin.f32 %v707_v34, 6.0  ;;  %v787_v44 = vmin.f32 %v723_v42, 6.0 }
 0x10e   :  { %v835_v35 = vpack.c.bf16 %v771_v43, %v771_v43  ;;  %v851_v45 = vpack.c.bf16 %v787_v44, %v787_v44 }
 0x110   :  { %900 = vst.msk [vmem:[%s1688_s4 + $0xbc] sm:$0xf] %vm852_vm1, %v835_v35 }
 0x111   :  { %916 = vst.msk [vmem:[%s1688_s4 + $0xfc] sm:$0xf] %vm852_vm1, %v851_v45 }

</bundles_post_ra>
